<compile_context>
chip_gen: v5e
topology: v5e:2x2
jax: 0.10.0
libtpu: 0.0.40
codegen_flags: <defaults>
</compile_context>

<pallas_src>
import functools

import jax
import jax.numpy as jnp
from jax.experimental import pallas as pl
from jax.experimental.pallas import tpu as pltpu


def _p_norm_lastdim(diff, p):
    """||diff||_p reduced over the last (lane) axis; diff is float32."""
    if p == 2.0:
        return jnp.sqrt(jnp.sum(diff * diff, axis=-1))
    if p == 1.0:
        return jnp.sum(jnp.abs(diff), axis=-1)
    ad = jnp.abs(diff)
    if float(p).is_integer() and 2.0 < p <= 8.0:
        # Small integer p: repeated VPU multiplies instead of exp/log-based
        # power on the single EUP slot over the full (TB, N, D) tensor.
        acc = ad
        for _ in range(int(p) - 1):
            acc = acc * ad
        s = jnp.sum(acc, axis=-1)
    else:
        s = jnp.sum(jnp.power(ad, p), axis=-1)
    # The 1/p root only touches the tiny reduced tensor.
    return jnp.power(s, 1.0 / p)


def _pairwise_distance_kernel(x1_ref, x2_ref, o_ref, *, p):
    # Accumulate in float32 even for bf16 inputs.
    x1 = x1_ref[...].astype(jnp.float32)   # (TB, N, D)
    x2 = x2_ref[...].astype(jnp.float32)   # (TB, N, D)

    diff1 = x1[:, 0:1, :] - x2             # (TB, N, D)
    # Compute over all N rows (avoids the unaligned sublane slice x1[:, 1:, :]);
    # the wrapper drops the first reduced element of this row.
    diff2 = x2[:, 0:1, :] - x1             # (TB, N, D)

    # Two full-width row writes, both starting at lane offset 0 (lane-dense slab).
    o_ref[:, 0, :] = _p_norm_lastdim(diff1, p).astype(o_ref.dtype)
    o_ref[:, 1, :] = _p_norm_lastdim(diff2, p).astype(o_ref.dtype)


def _choose_batch_tile(B, N, D, in_itemsize):
    """Largest batch tile that keeps the double-buffered VMEM footprint small."""
    vmem_budget = 16 * 1024 * 1024  # comfortably inside v7x's 32 MiB scoped default
    # 2 inputs x 2 buffers + output x 2 buffers, per batch row.
    bytes_per_row = 2 * (2 * N * D * in_itemsize) + 2 * (2 * N * 4)
    tb = max(1, min(B, vmem_budget // max(bytes_per_row, 1)))
    # Keep >= ~4 grid steps when possible so DMA/compute overlap and the two
    # v7x TensorCores ("parallel" batch axis) both get work.
    tb = min(tb, max(1, pl.cdiv(B, 4)))
    return int(tb)


def batch_pairwise_distance(x1, x2, p=2.0):
    """Pallas implementation of BatchPairwiseDistance.forward.

    x1, x2: (B, N, D). Returns (B, 2N - 1) float32.
    (`eps` and `keepdim` of the torch module are unused by its forward().)
    """
    assert x1.shape == x2.shape and x1.ndim == 3
    assert float(p) > 0.0
    B, N, D = x1.shape
    tb = _choose_batch_tile(B, N, D, jnp.dtype(x1.dtype).itemsize)

    kernel = functools.partial(_pairwise_distance_kernel, p=float(p))

    packed = pl.pallas_call(
        kernel,
        out_shape=jax.ShapeDtypeStruct((B, 2, N), jnp.float32),
        grid=(pl.cdiv(B, tb),),
        in_specs=[
            pl.BlockSpec((tb, N, D), lambda i: (i, 0, 0)),
            pl.BlockSpec((tb, N, D), lambda i: (i, 0, 0)),
        ],
        out_specs=pl.BlockSpec((tb, 2, N), lambda i: (i, 0, 0)),
        compiler_params=pltpu.CompilerParams(
            dimension_semantics=("parallel",)
        ),
    )(x1, x2)

    # Final slice + concat on the tiny reduced result, outside the kernel:
    # out[:, :N] = ||x1[:,0]-x2[:,n]||,  out[:, N:] = ||x2[:,0]-x1[:,m]||, m >= 1.
    return jnp.concatenate([packed[:, 0, :], packed[:, 1, 1:]], axis=1)


def _reference(x1, x2, p=2.0):
    part1 = x1[:, 0:1, :] - x2
    part2 = x2[:, 0:1, :] - x1[:, 1:, :]
    res = jnp.concatenate([part1, part2], axis=1)
    return jnp.sum(jnp.abs(res) ** p, axis=2) ** (1.0 / p)


if __name__ == "__main__":
    B, N, D = 2, 8, 32
    key = jax.random.PRNGKey(0)
    k1, k2 = jax.random.split(key)
    x1 = jax.random.normal(k1, (B, N, D), dtype=jnp.float32)
    x2 = jax.random.normal(k2, (B, N, D), dtype=jnp.float32)

    # p = 2, float32 (primary path)
    out = jax.block_until_ready(batch_pairwise_distance(x1, x2, p=2.0))
    ref = _reference(x1, x2, p=2.0)
    assert out.shape == (B, 2 * N - 1), out.shape
    assert jnp.allclose(out, ref, atol=1e-5, rtol=1e-5), (out, ref)

    # p = 1, bfloat16 inputs (exercises f32 accumulation + abs/sum fast path)
    x1b, x2b = x1.astype(jnp.bfloat16), x2.astype(jnp.bfloat16)
    out1 = jax.block_until_ready(batch_pairwise_distance(x1b, x2b, p=1.0))
    ref1 = _reference(x1b.astype(jnp.float32), x2b.astype(jnp.float32), p=1.0)
    assert out1.shape == (B, 2 * N - 1), out1.shape
    assert jnp.allclose(out1, ref1, atol=1e-4, rtol=1e-4), (out1, ref1)

    # p = 3 (small-integer-p repeated-multiply path)
    out3 = jax.block_until_ready(batch_pairwise_distance(x1, x2, p=3.0))
    ref3 = _reference(x1, x2, p=3.0)
    assert jnp.allclose(out3, ref3, atol=2e-3, rtol=2e-3), (out3, ref3)

    print("KERNEL_OK")
</pallas_src>

<mosaic_0001>
module attributes {stable_mosaic.version = 11 : i64} {
  func.func @_pairwise_distance_kernel(%arg0: i32, %arg1: memref<1x8x32xf32, #tpu.memory_space<vmem>>, %arg2: memref<1x8x32xf32, #tpu.memory_space<vmem>>, %arg3: memref<1x2x8xf32, #tpu.memory_space<vmem>>) attributes {dimension_semantics = [#tpu.dimension_semantics<parallel>], iteration_bounds = array<i64: 2>, scalar_prefetch = 0 : i64, scratch_operands = 0 : i64, tpu.core_type = #tpu.core_type<tc>, window_params = [{transform_indices = @transform_0, window_bounds = array<i64: 1, 8, 32>}, {transform_indices = @transform_1, window_bounds = array<i64: 1, 8, 32>}, {transform_indices = @transform_2, window_bounds = array<i64: 1, 2, 8>}]} {
    %c0 = arith.constant 0 : index
    %c0_0 = arith.constant 0 : index
    %c0_1 = arith.constant 0 : index
    %0 = vector.load %arg1[%c0, %c0_0, %c0_1] : memref<1x8x32xf32, #tpu.memory_space<vmem>>, vector<1x8x32xf32>
    %c0_2 = arith.constant 0 : index
    %c0_3 = arith.constant 0 : index
    %c0_4 = arith.constant 0 : index
    %1 = vector.load %arg2[%c0_2, %c0_3, %c0_4] : memref<1x8x32xf32, #tpu.memory_space<vmem>>, vector<1x8x32xf32>
    %2 = vector.extract_strided_slice %0 {offsets = [0, 0, 0], sizes = [1, 1, 32], strides = [1, 1, 1]} : vector<1x8x32xf32> to vector<1x1x32xf32>
    %3 = vector.broadcast %2 : vector<1x1x32xf32> to vector<1x8x32xf32>
    %4 = arith.subf %3, %1 : vector<1x8x32xf32>
    %5 = vector.extract_strided_slice %1 {offsets = [0, 0, 0], sizes = [1, 1, 32], strides = [1, 1, 1]} : vector<1x8x32xf32> to vector<1x1x32xf32>
    %6 = vector.broadcast %5 : vector<1x1x32xf32> to vector<1x8x32xf32>
    %7 = arith.subf %6, %0 : vector<1x8x32xf32>
    %8 = arith.mulf %4, %4 : vector<1x8x32xf32>
    %cst = arith.constant dense<0.000000e+00> : vector<1x8xf32>
    %9 = vector.multi_reduction <add>, %8, %cst [2] : vector<1x8x32xf32> to vector<1x8xf32>
    %10 = math.sqrt %9 : vector<1x8xf32>
    %c0_5 = arith.constant 0 : index
    %c0_6 = arith.constant 0 : index
    %c0_7 = arith.constant 0 : index
    %11 = vector.load %arg3[%c0_5, %c0_6, %c0_7] : memref<1x2x8xf32, #tpu.memory_space<vmem>>, vector<1x1x8xf32>
    %12 = vector.shape_cast %11 : vector<1x1x8xf32> to vector<1x8xf32>
    %13 = vector.shape_cast %10 : vector<1x8xf32> to vector<1x1x8xf32>
    tpu.vector_store %arg3[%c0_5, %c0_6, %c0_7], %13 {strides = array<i32>} : memref<1x2x8xf32, #tpu.memory_space<vmem>>, vector<1x1x8xf32>,
    %14 = arith.mulf %7, %7 : vector<1x8x32xf32>
    %cst_8 = arith.constant dense<0.000000e+00> : vector<1x8xf32>
    %15 = vector.multi_reduction <add>, %14, %cst_8 [2] : vector<1x8x32xf32> to vector<1x8xf32>
    %16 = math.sqrt %15 : vector<1x8xf32>
    %c0_9 = arith.constant 0 : index
    %c1 = arith.constant 1 : index
    %c0_10 = arith.constant 0 : index
    %17 = vector.load %arg3[%c0_9, %c1, %c0_10] : memref<1x2x8xf32, #tpu.memory_space<vmem>>, vector<1x1x8xf32>
    %18 = vector.shape_cast %17 : vector<1x1x8xf32> to vector<1x8xf32>
    %19 = vector.shape_cast %16 : vector<1x8xf32> to vector<1x1x8xf32>
    tpu.vector_store %arg3[%c0_9, %c1, %c0_10], %19 {strides = array<i32>} : memref<1x2x8xf32, #tpu.memory_space<vmem>>, vector<1x1x8xf32>,
    return
  }
  func.func @transform_0(%arg0: i32) -> (i32, i32, i32) {
    %c0_i32 = arith.constant 0 : i32
    %c0_i32_0 = arith.constant 0 : i32
    %c0_i32_1 = arith.constant 0 : i32
    return %arg0, %c0_i32, %c0_i32_0 : i32, i32, i32
  }
  func.func @transform_1(%arg0: i32) -> (i32, i32, i32) {
    %c0_i32 = arith.constant 0 : i32
    %c0_i32_0 = arith.constant 0 : i32
    %c0_i32_1 = arith.constant 0 : i32
    return %arg0, %c0_i32, %c0_i32_0 : i32, i32, i32
  }
  func.func @transform_2(%arg0: i32) -> (i32, i32, i32) {
    %c0_i32 = arith.constant 0 : i32
    %c0_i32_0 = arith.constant 0 : i32
    %c0_i32_1 = arith.constant 0 : i32
    return %arg0, %c0_i32, %c0_i32_0 : i32, i32, i32
  }
}

</mosaic_0001>

<bundles_post_ra>
// kernel: tpu_custom_call.1
= control target key start
LH: loop header
LB: loop body
LE: loop exit
PB: predicated region body
PF: predicated region fallthrough
CT: control target
= control target key end

     0   :  { %7 = vsyncpa [#allocation3], 0  ;;  %s739_s0 = inlined_call_operand.hbm [shape: f32[2,8,32], index: 0, kind: input, shape index: {}]   ;;  %s740_s1 = inlined_call_operand.hbm [shape: f32[2,8,32], index: 1, kind: input, shape index: {}]   ;;  %s741_s2 = inlined_call_operand.hbm [shape: f32[2,2,8], index: 2, kind: output, shape index: {}]  }
   0x1   :  { %9 = vsyncpa [#allocation3 + $0x1], 0 }
   0x2   :  { %10 = vsyncpa [#allocation6], 0 }
   0x3   :  { %12 = vsyncpa [#allocation6 + $0x1], 0 }
   0x4   :  { %13 = vsyncpa [#allocation4], 0 }
   0x5   :  { %15 = vsyncpa [#allocation4 + $0x1], 0  ;;  %s576_s9 = smov 0   ;;  %s578_s10 = smov 0  }
   0x6   :  { %s580_s11 = smov 0   ;;  %s582_s12 = smov 0  }
   0x7 LB: > { %s597_s13 = sadd.s32 4294967295, %s559_s12   ;;  %s359_s14 = sadd.s32 4294967294, %s559_s12   ;;  %s559_s12 = sphi %s582_s12, %s752_s12   ;;  %s555_s11 = sphi %s580_s11, %s751_s11   ;;  %s551_s10 = sphi %s578_s10, %s750_s10   ;;  %s547_s9 = sphi %s576_s9, %s749_s9  }
   0x8   : > { %s601_s15 = sadd.s32 1, %s559_s12   ;;  %s28_s16 = sadd.s32 1, %s555_s11 }
   0x9   : > { %s25_s17 = ssub.s32 %s559_s12, %s601_s15  ;;  %p35_p0 = scmp.ne.s32.totalorder %s555_s11, %s551_s10 }
   0xa   : > { %p26_p1 = scmp.eq.s32.totalorder %s25_s17, 0  ;;  %p36_p2 = scmp.eq.s32.totalorder %s559_s12, 0 }
   0xb   : > { %p41_p3 = scmp.ne.s32.totalorder %s551_s10, %s547_s9  ;;  %p42_p4 = scmp.eq.s32.totalorder %s597_s13, 0 }
   0xc   : > { %s613_s18 = scalar_select %p26_p1, %s555_s11, %s28_s16  }
   0xd   : > { %p615_p5 = por %p36_p2, %p35_p0  ;;  %p619_p6 = por %p42_p4, %p41_p3 }
   0xe   : > { %p91_p7 = scmp.eq.s32.totalorder %s597_s13, 1  ;;  %p97_p8 = scmp.eq.s32.totalorder %s359_s14, 1 }
   0xf   : > { %p391_p10 = scmp.lt.s32.totalorder %s559_s12, 2  ;;  %s635_s23 = sand.u32 1, %s555_s11  }
  0x10   : > { %p626_p11 = por %p91_p7, %p35_p0  ;;  %p630_p12 = por %p97_p8, %p41_p3 }
  0x11   : > { %s363_s24 = sshll.u32 %s559_s12, 3  ;;  %s362_s25 = sshll.u32 %s635_s23, 3 }
  0x12   : > { %s125_s28 = scalar_lea.hbm %s739_s0, %s363_s24  ;;  %s121_s30 = scalar_lea.vmem [#allocation2], %s362_s25 }
  0x13   : > { %s127_s29 = sshll.u32 %s125_s28, 4  ;;  %s129_s3 = sshll.u32 %s121_s30, 4  ;;  %s128_s29 = int_to_ptr.hbm [resolvable:$true] %s127_s29  ;;  %s130_s3 = int_to_ptr.vmem [resolvable:$true] %s129_s3 }
  0x14   : > { %p644_p13 = pnand %p391_p10, %p615_p5  ;;  %p366_p0 = scmp.ge.s32.totalorder %s559_s12, 1 }
  0x15   : > { %p153_p1 = scmp.lt.s32.totalorder %s559_s12, 3  ;;  %s118_s5 = scalar_lea.sflag [#allocation3], %s635_s23 }
  0x16   : > { %s429_s6 = sshra.s32 %s128_s29, 4  ;;  %p433_p3 = pneg %p644_p13  ;;  %s430_s6 = int_to_ptr.hbm [resolvable:$true] %s429_s6 }
  0x17   : > { %s431_s7 = scalar_lea.hbm %s430_s6, 8  ;;  %s436_s16 = scalar_lea.hbm %s739_s0, 16 }
  0x18   : > { %p432_p2 = scmp.ne.s32.totalorder %s430_s6, %s431_s7  ;;  %p437_p5 = scmp.lt.s32.totalorder %s430_s6, %s739_s0 }
  0x19   : > { %p438_p8 = scmp.lt.s32.totalorder %s436_s16, %s431_s7 }
  0x1a   : > { %p434_p4 = pnand %p433_p3, %p432_p2 }
  0x1b   : > { %p439_p10 = por %p438_p8, %p437_p5 }
  0x1c   : > { %p435_p7 = pneg %p434_p4 }
  0x1e   : > { %p440_p9 = pnand %p439_p10, %p435_p7 }
  0x20   : > { %443 = shalt.err (!%p440_p9)
}
  0x21   : > { %383 = dma.hbm_to_vmem [thread:$0]  (!%p644_p13), %s128_s29, 128, %s130_s3, %s118_s5  }
  0x22   : > { %p668_p2 = pnand %p366_p0, %p153_p1  ;;  %s144_s30 = scalar_lea.hbm %s740_s1, %s363_s24 }
  0x23   : > { %s146_s6 = sshll.u32 %s144_s30, 4  ;;  %s140_s7 = scalar_lea.vmem [#allocation5], %s362_s25  ;;  %s147_s6 = int_to_ptr.hbm [resolvable:$true] %s146_s6 }
  0x24   : > { %s148_s8 = sshll.u32 %s140_s7, 4  ;;  %s137_s14 = scalar_lea.sflag [#allocation6], %s635_s23  ;;  %s149_s8 = int_to_ptr.vmem [resolvable:$true] %s148_s8 }
  0x25   : > { %s459_s16 = sshra.s32 %s147_s6, 4  ;;  %s466_s5 = scalar_lea.hbm %s740_s1, 16  ;;  %s460_s16 = int_to_ptr.hbm [resolvable:$true] %s459_s16 }
  0x26   : > { %s461_s17 = scalar_lea.hbm %s460_s16, 8  ;;  %p467_p4 = scmp.lt.s32.totalorder %s460_s16, %s740_s1 }
  0x27   : > { %p462_p9 = scmp.ne.s32.totalorder %s460_s16, %s461_s17  ;;  %p468_p7 = scmp.lt.s32.totalorder %s466_s5, %s461_s17 }
  0x29   : > { %p464_p0 = pnand %p462_p9, %p433_p3  ;;  %p469_p5 = por %p468_p7, %p467_p4 }
  0x2b   : > { %p465_p1 = pneg %p464_p0 }
  0x2d   : > { %p470_p8 = pnand %p469_p5, %p465_p1 }
  0x2f   : > { %473 = shalt.err (!%p470_p8)
}
  0x30   : > { %386 = dma.hbm_to_vmem [thread:$0]  (!%p644_p13), %s147_s6, 128, %s149_s8, %s137_s14  }
  0x31   : > { %157 = sbr.rel (%p668_p2) target bundleno = 215 (0xd7), region = 28  ;;  %s690_s23 = sand.u32 (!%p668_p2), 1, %s551_s10  }
  0x32   : > { %s367_s25 = sshll.u32 (!%p668_p2), %s690_s23, 3  ;;  %s160_s27 = scalar_lea.sflag (!%p668_p2), [#allocation3], %s690_s23 }
  0x33   : > { %s163_s28 = scalar_lea.vmem (!%p668_p2), [#allocation2], %s367_s25 }
  0x36   : > { %534 = dma.done.wait (%p619_p6), %s160_s27, 128  }
  0x37   : > { %536 = vsyncadd (%p619_p6), %s160_s27, 4294967168  ;;  %s170_s4 = scalar_lea.sflag [#allocation6], %s690_s23  ;;  %s173_s30 = scalar_lea.vmem [#allocation5], %s367_s25 }
  0x38   : > { %538 = dma.done.wait (%p619_p6), %s170_s4, 128  }
  0x39   : > { %540 = vsyncadd (%p619_p6), %s170_s4, 4294967168  ;;  %v200_v0 = vld [vmem:[%s163_s28] sm:$0xff]  ;;  %v201_v1 = vld [vmem:[%s173_s30] sm:$0xff]  ;;  %vm207_vm0 = vcmask 261120   ;;  %v224_v17 = vlaneseq  ;;  %s369_s20 = sshll.u32 %s690_s23, 1  ;;  %vm228_vm3 = vcmask 57344  }
  0x3a   : > { %v202_v2 = vperm.slane %v200_v0, 0  ;;  %v204_v3 = vperm.slane %v201_v1, 0  ;;  %s371_s26 = sshll.u32 %s597_s13, 1  ;;  %s199_s6 = scalar_lea.vmem [#allocation7], %s369_s20 }
  0x3b   : > { %v225_v22 = vand.u32 127, %v224_v17  ;;  %s261_s14 = scalar_lea.hbm %s741_s2, %s371_s26  ;;  %s263_s16 = sshll.u32 %s199_s6, 4  ;;  %s264_s16 = int_to_ptr.vmem [resolvable:$true] %s263_s16 }
  0x3c   : > { %v203_v4 = vsub.f32 %v202_v2, %v201_v1  ;;  %v205_v6 = vsub.f32 %v204_v3, %v200_v0  ;;  %s265_s17 = sshll.u32 %s261_s14, 4  ;;  %s251_s13 = scalar_lea.sflag [#allocation4], %s690_s23  ;;  %s266_s17 = int_to_ptr.hbm [resolvable:$true] %s265_s17 }
  0x3d   : > { %s503_s29 = sshra.s32 %s266_s17, 4  ;;  %s509_s24 = scalar_lea.hbm %s741_s2, 4  ;;  %s504_s29 = int_to_ptr.hbm [resolvable:$true] %s503_s29 }
  0x3e   : > { %v206_v5 = vmul.f32 %v203_v4, %v203_v4  ;;  %v230_v8 = vmul.f32 %v205_v6, %v205_v6  ;;  %s505_s3 = scalar_lea.hbm %s504_s29, 2  ;;  %p510_p10 = scmp.lt.s32.totalorder %s504_s29, %s741_s2 }
  0x3f   : > { %p506_p6 = scmp.ne.s32.totalorder %s504_s29, %s505_s3  ;;  %p511_p2 = scmp.lt.s32.totalorder %s509_s24, %s505_s3 }
  0x40   : > { %v208_v7 = vsel %vm207_vm0, %v206_v5, 0.0  ;;  %v231_v9 = vsel %vm207_vm0, %v230_v8, 0.0 }
  0x41   : > { %209 = vadd.xlane.f32.xlu0 %v208_v7  ;;  %p507_p13 = pnand %p506_p6, %p626_p11  ;;  %p512_p9 = por %p511_p2, %p510_p10 }
  0x43   : > { %p508_p3 = pneg %p507_p13 }
  0x45   : > { %p513_p0 = pnand %p512_p9, %p508_p3 }
  0x49   : > { %232 = vadd.xlane.f32.xlu0 %v231_v9 }
  0xb4   : > { %v210_v10 = vpop.xlane.xlu0 %209 }
  0xb5   : > { %425 = vrsqrt.f32 %v210_v10  ;;  %vm218_vm1 = vcmp.eq.f32.partialorder %v210_v10, inf  ;;  %v221_v24 = vand.u32 2147483648, %v210_v10  ;;  %vm220_vm2 = vcmp.eq.f32.partialorder %v210_v10, 0.0 }
  0xbb   : > { %v426_v11 = vpop.eup %425 }
  0xbc   : > { %v212_v12 = vmul.f32 %v426_v11, %v210_v10  ;;  %v233_v13 = vpop.xlane.xlu0 %232 }
  0xbd   : > { %427 = vrsqrt.f32 %v233_v13  ;;  %vm241_vm4 = vcmp.eq.f32.partialorder %v233_v13, inf  ;;  %v244_v32 = vand.u32 2147483648, %v233_v13  ;;  %vm243_vm5 = vcmp.eq.f32.partialorder %v233_v13, 0.0 }
  0xbe   : > { %v213_v14 = vmul.f32 %v426_v11, %v212_v12 }
  0xc0   : > { %v214_v15 = vmul.f32 0.5, %v213_v14 }
  0xc2   : > { %v215_v16 = vsub.f32 1.5, %v214_v15 }
  0xc3   : > { %v428_v18 = vpop.eup %427 }
  0xc4   : > { %v216_v19 = vmul.f32 %v426_v11, %v215_v16  ;;  %v235_v20 = vmul.f32 %v428_v18, %v233_v13 }
  0xc6   : > { %v217_v21 = vmul.f32 %v216_v19, %v210_v10  ;;  %v236_v23 = vmul.f32 %v428_v18, %v235_v20 }
  0xc8   : > { %v219_v25 = vsel %vm218_vm1, %v210_v10, %v217_v21  ;;  %v237_v26 = vmul.f32 0.5, %v236_v23 }
  0xc9   : > { %v222_v27 = vsel %vm220_vm2, %v221_v24, %v219_v25 }
  0xca   : > { %v238_v28 = vsub.f32 1.5, %v237_v26  ;;  %v226_v29 = vperm.slane %v222_v27, %v225_v22 }
  0xcc   : > { %v239_v30 = vmul.f32 %v428_v18, %v238_v28  ;;  %229 = vst.msk [vmem:[%s199_s6] sm:$0x1] %vm228_vm3, %v226_v29 }
  0xce   : > { %v240_v31 = vmul.f32 %v239_v30, %v233_v13 }
  0xd0   : > { %v242_v33 = vsel %vm241_vm4, %v233_v13, %v240_v31 }
  0xd1   : > { %v245_v34 = vsel %vm243_vm5, %v244_v32, %v242_v33 }
  0xd2   : > { %v247_v35 = vperm.slane %v245_v34, %v225_v22 }
  0xd4   : > { %249 = vst.msk [vmem:[%s199_s6 + $0x1] sm:$0x1] %vm228_vm3, %v247_v35 }
  0xd5   : > { %516 = shalt.err (!%p513_p0)
}
  0xd6   : > { %378 = dma.vmem_to_hbm [thread:$0]  (%p626_p11), %s264_s16, 32, %s266_s17, %s251_s13  }
  0xd7 PF: > { %s277_s23 = sand.u32 1, %s547_s9   ;;  %p748_p1 = scmp.ge.s32.totalorder %s559_s12, 2 }
  0xd8   : > { %s278_s28 = scalar_lea.sflag [#allocation4], %s277_s23 }
  0xd9   : > { %p388_p4 = pnand %p748_p1, %p630_p12 }
  0xdb   : > { %p389_p7 = pneg %p388_p4 }
  0xdd   : > { %542 = dma.done.wait (%p389_p7), %s278_s28, 32  }
  0xde   : > { %544 = vsyncadd (%p389_p7), %s278_s28, 4294967264  ;;  %p18_p5 = scmp.ge.s32.totalorder %s601_s15, 4   ;;  %s749_s9 = smov %s551_s10 }
  0xdf   : > { %s750_s10 = smov %s555_s11  ;;  %s751_s11 = smov %s613_s18 }
  0xe0   : > { %s752_s12 = smov %s601_s15  ;;  %20 = sbr.rel (!%p18_p5) target bundleno = 7 (0x7), region = 86 }
  0xe5   :  { %284 = vsyncpa [#allocation3], 1 }
  0xe6   :  { %286 = vsyncpa [#allocation3 + $0x1], 1 }
  0xe7   :  { %287 = vsyncpa [#allocation6], 1 }
  0xe8   :  { %289 = vsyncpa [#allocation6 + $0x1], 1 }
  0xe9   :  { %290 = vsyncpa [#allocation4], 1 }
  0xea   :  { %292 = vsyncpa [#allocation4 + $0x1], 1 }

</bundles_post_ra>
